<compile_context>
chip_gen: v7x
topology: tpu7x:2x2x1
jax: 0.10.0
libtpu: 0.0.40
codegen_flags: <defaults>
</compile_context>

<pallas_src>
import functools

import jax
import jax.numpy as jnp
from jax.experimental import pallas as pl
from jax.experimental.pallas import tpu as pltpu

HIDDEN = 32                    # hidden_dim of the module
PACK = 128 // HIDDEN           # logical rows packed per 128-lane row (= 4)
LANES = PACK * HIDDEN          # 128
MAX_PACKED_TILE = 512          # packed rows per grid step (512x128 f32 = 256 KiB)


def _round_up(x, m):
    return (x + m - 1) // m * m


# ----------------------------------------------------------------------------
# Kernel 1: fused single affine  y = x @ W_block + b_block
#   x is the lane-packed row stream [tile, 128]; W_block is the 128x128
#   block-diagonal replication of the fused 32x32 weight; b_block is the
#   fused bias tiled across the 4 packed row slots.
# ----------------------------------------------------------------------------
def affine_kernel(x_ref, w_ref, b_ref, o_ref):
    y = jnp.dot(x_ref[...], w_ref[...], preferred_element_type=jnp.float32)
    o_ref[...] = (y + b_ref[...]).astype(o_ref.dtype)


def run_affine(rows, w_eff, b_eff):
    """rows: [M, HIDDEN] f32 -> [M, HIDDEN] = rows @ w_eff + b_eff."""
    m, h = rows.shape
    assert h == HIDDEN

    # Pack 4 logical rows into each 128-lane row (lane-dense loads/stores).
    m4 = _round_up(m, PACK)
    rows_p = jnp.pad(rows, ((0, m4 - m), (0, 0)))
    x_packed = rows_p.reshape(m4 // PACK, LANES)
    mp = x_packed.shape[0]

    # Tile: multiple of 8 sublanes, capped at MAX_PACKED_TILE, and at least
    # 2 grid steps so both v7x TensorCores get work on the "parallel" axis.
    tile = min(MAX_PACKED_TILE, _round_up(pl.cdiv(mp, 2), 8))
    mp_pad = max(_round_up(mp, tile), 2 * tile)
    x_packed = jnp.pad(x_packed, ((0, mp_pad - mp), (0, 0)))

    # Block-diagonal weight replication + lane-tiled bias (built once in JAX,
    # outside the kernel).
    w_block = jnp.kron(jnp.eye(PACK, dtype=w_eff.dtype), w_eff)     # (128, 128)
    b_block = jnp.tile(b_eff, (1, PACK))                             # (1, 128)

    grid = (mp_pad // tile,)
    out = pl.pallas_call(
        affine_kernel,
        out_shape=jax.ShapeDtypeStruct((mp_pad, LANES), rows.dtype),
        grid_spec=pltpu.PrefetchScalarGridSpec(
            num_scalar_prefetch=0,
            grid=grid,
            in_specs=[
                pl.BlockSpec((tile, LANES), lambda i: (i, 0)),
                # Constant index maps: weight/bias blocks are not re-DMA'd
                # between grid steps (block index never changes).
                pl.BlockSpec((LANES, LANES), lambda i: (0, 0)),
                pl.BlockSpec((1, LANES), lambda i: (0, 0)),
            ],
            out_specs=pl.BlockSpec((tile, LANES), lambda i: (i, 0)),
        ),
        compiler_params=pltpu.CompilerParams(
            dimension_semantics=("parallel",),
            vmem_limit_bytes=32 * 1024 * 1024,   # explicit; safe on v5e/v6e/v7x
        ),
    )(x_packed, w_block, b_block)

    return out[:mp].reshape(m4, h)[:m]


# ----------------------------------------------------------------------------
# Kernel 2: cosine similarity, one launch for all (positive + negative) sims.
#   q: [B, 1, H], v: [B, K, H] -> [B, 1, K]; grid over batch.
# ----------------------------------------------------------------------------
def cosine_kernel(q_ref, v_ref, o_ref):
    # eps clamps each squared norm (eps^2) per vector; identical to
    # torch.nn.functional.cosine_similarity for non-degenerate vectors.
    eps = 1e-8
    q = q_ref[0].astype(jnp.float32)          # (1, H)
    v = v_ref[0].astype(jnp.float32)          # (K, H)
    q_inv = jax.lax.rsqrt(jnp.maximum(jnp.sum(q * q, axis=-1, keepdims=True),
                                      eps * eps))
    v_inv = jax.lax.rsqrt(jnp.maximum(jnp.sum(v * v, axis=-1, keepdims=True),
                                      eps * eps))
    sims = jnp.einsum('qh,kh->qk', q * q_inv, v * v_inv,
                      preferred_element_type=jnp.float32)
    o_ref[0] = sims.astype(o_ref.dtype)


def run_cosine(q, v):
    """q: [B, H], v: [B, K, H] -> [B, K] cosine similarities (single launch)."""
    b, k, h = v.shape
    out = pl.pallas_call(
        cosine_kernel,
        out_shape=jax.ShapeDtypeStruct((b, 1, k), jnp.float32),
        grid_spec=pltpu.PrefetchScalarGridSpec(
            num_scalar_prefetch=0,
            grid=(b,),
            in_specs=[
                pl.BlockSpec((1, 1, h), lambda i: (i, 0, 0)),
                pl.BlockSpec((1, k, h), lambda i: (i, 0, 0)),
            ],
            out_specs=pl.BlockSpec((1, 1, k), lambda i: (i, 0, 0)),
        ),
        compiler_params=pltpu.CompilerParams(
            dimension_semantics=("parallel",)),
    )(q.reshape(b, 1, h), v)
    return out.reshape(b, k)


# ----------------------------------------------------------------------------
# Parameter init (deterministic, matches nn.Linear(hidden, hidden) x3 shapes)
# ----------------------------------------------------------------------------
def init_params(key, hidden):
    params = []
    for _ in range(3):
        kw, kb, key = jax.random.split(key, 3)
        # stored already transposed: (in, out), so the affine is x @ w + b
        w = jax.random.normal(kw, (hidden, hidden), jnp.float32) * 0.05
        b = jax.random.normal(kb, (1, hidden), jnp.float32) * 0.01
        params.append((w, b))
    return params


def fuse_affine(params):
    """Collapse the 3 bias-only Linears into one exact affine map (eval mode)."""
    (w1, b1), (w2, b2), (w3, b3) = params
    w_eff = w1 @ w2 @ w3
    b_eff = (b1 @ w2 + b2) @ w3 + b3
    return w_eff, b_eff


# ----------------------------------------------------------------------------
# Forward = convert_vector (fused affine, Pallas) + dropout(eval=identity)
#           + CrossMatchLoss (assumed definition, see TODO above)
# ----------------------------------------------------------------------------
def forward(params, input_vector, positive_vectors, negative_vectors,
            positive_semantic_match_scores, negative_semantic_match_scores,
            semantic_match_factor=0.1):
    b, h = input_vector.shape
    p = positive_vectors.shape[1]
    n = negative_vectors.shape[1]

    # Exact algebraic fusion of the 3 Linear layers, done once in JAX glue.
    w_eff, b_eff = fuse_affine(params)

    # One Pallas launch for ALL rows (query + positives + negatives).
    rows = jnp.concatenate(
        [input_vector,
         positive_vectors.reshape(b * p, h),
         negative_vectors.reshape(b * n, h)], axis=0)
    converted = run_affine(rows, w_eff, b_eff)

    q = converted[:b]                                   # dropout == identity (eval)
    pos = converted[b:b + b * p].reshape(b, p, h)
    neg = converted[b + b * p:b + b * (p + n)].reshape(b, n, h)

    # One Pallas launch for ALL similarities (positives + negatives merged).
    sims = run_cosine(q, jnp.concatenate([pos, neg], axis=1))       # (B, P+N)
    sims_pos, sims_neg = sims[:, :p], sims[:, p:]

    # Assumed CrossMatchLoss: logistic match loss + semantic-score regression.
    match_loss = (jnp.mean(jax.nn.softplus(-sims_pos)) +
                  jnp.mean(jax.nn.softplus(sims_neg)))
    semantic_loss = (jnp.mean((sims_pos - positive_semantic_match_scores) ** 2) +
                     jnp.mean((sims_neg - negative_semantic_match_scores) ** 2))
    return match_loss + semantic_match_factor * semantic_loss


if __name__ == "__main__":
    B, H, P, N = 2, HIDDEN, 3, 5

    key = jax.random.PRNGKey(0)
    kp, k1, k2, k3, k4, k5 = jax.random.split(key, 6)
    params = init_params(kp, H)

    input_vector = jax.random.normal(k1, (B, H), jnp.float32)
    positive_vectors = jax.random.normal(k2, (B, P, H), jnp.float32)
    negative_vectors = jax.random.normal(k3, (B, N, H), jnp.float32)
    positive_scores = jax.random.uniform(k4, (B, P), jnp.float32)
    negative_scores = jax.random.uniform(k5, (B, N), jnp.float32)

    fwd = jax.jit(functools.partial(forward, semantic_match_factor=0.1))
    loss = fwd(params, input_vector, positive_vectors, negative_vectors,
               positive_scores, negative_scores)
    loss = jax.block_until_ready(loss)
    assert loss.shape == () and bool(jnp.isfinite(loss))
    print("KERNEL_OK")
</pallas_src>

<mosaic_0001>
module attributes {stable_mosaic.version = 11 : i64} {
  func.func @affine_kernel(%arg0: i32, %arg1: memref<8x128xf32, #tpu.memory_space<vmem>>, %arg2: memref<128x128xf32, #tpu.memory_space<vmem>>, %arg3: memref<1x128xf32, #tpu.memory_space<vmem>>, %arg4: memref<8x128xf32, #tpu.memory_space<vmem>>) attributes {dimension_semantics = [#tpu.dimension_semantics<parallel>], iteration_bounds = array<i64: 2>, scalar_prefetch = 0 : i64, scratch_operands = 0 : i64, tpu.core_type = #tpu.core_type<tc>, window_params = [{transform_indices = @transform_0, window_bounds = array<i64: 8, 128>}, {pipeline_mode = #tpu.pipeline_mode<synchronous>, transform_indices = @transform_1, window_bounds = array<i64: 128, 128>}, {pipeline_mode = #tpu.pipeline_mode<synchronous>, transform_indices = @transform_2, window_bounds = array<i64: 1, 128>}, {transform_indices = @transform_3, window_bounds = array<i64: 8, 128>}]} {
    %c0 = arith.constant 0 : index
    %c0_0 = arith.constant 0 : index
    %0 = vector.load %arg1[%c0, %c0_0] : memref<8x128xf32, #tpu.memory_space<vmem>>, vector<8x128xf32>
    %c0_1 = arith.constant 0 : index
    %c0_2 = arith.constant 0 : index
    %1 = vector.load %arg2[%c0_1, %c0_2] : memref<128x128xf32, #tpu.memory_space<vmem>>, vector<128x128xf32>
    %cst = arith.constant dense<0.000000e+00> : vector<8x128xf32>
    %2 = tpu.matmul %0, %1, %cst {dimension_numbers = #tpu.dot_dimension_numbers<[1], [0], [0], [1], [0, 0, 1, 1], [], []>} : vector<8x128xf32>, vector<128x128xf32>, vector<8x128xf32> -> vector<8x128xf32>
    %c0_3 = arith.constant 0 : index
    %c0_4 = arith.constant 0 : index
    %3 = vector.load %arg3[%c0_3, %c0_4] : memref<1x128xf32, #tpu.memory_space<vmem>>, vector<1x128xf32>
    %4 = vector.broadcast %3 : vector<1x128xf32> to vector<8x128xf32>
    %5 = arith.addf %2, %4 : vector<8x128xf32>
    %c0_5 = arith.constant 0 : index
    %c0_6 = arith.constant 0 : index
    %6 = vector.load %arg4[%c0_5, %c0_6] : memref<8x128xf32, #tpu.memory_space<vmem>>, vector<8x128xf32>
    tpu.vector_store %arg4[%c0_5, %c0_6], %5 {strides = array<i32>} : memref<8x128xf32, #tpu.memory_space<vmem>>, vector<8x128xf32>,
    return
  }
  func.func @transform_0(%arg0: i32) -> (i32, i32) {
    %c0_i32 = arith.constant 0 : i32
    %c0_i32_0 = arith.constant 0 : i32
    return %arg0, %c0_i32 : i32, i32
  }
  func.func @transform_1(%arg0: i32) -> (i32, i32) {
    %c0_i32 = arith.constant 0 : i32
    %c0_i32_0 = arith.constant 0 : i32
    %c0_i32_1 = arith.constant 0 : i32
    return %c0_i32, %c0_i32_0 : i32, i32
  }
  func.func @transform_2(%arg0: i32) -> (i32, i32) {
    %c0_i32 = arith.constant 0 : i32
    %c0_i32_0 = arith.constant 0 : i32
    %c0_i32_1 = arith.constant 0 : i32
    return %c0_i32, %c0_i32_0 : i32, i32
  }
  func.func @transform_3(%arg0: i32) -> (i32, i32) {
    %c0_i32 = arith.constant 0 : i32
    %c0_i32_0 = arith.constant 0 : i32
    return %arg0, %c0_i32 : i32, i32
  }
}

module attributes {stable_mosaic.version = 11 : i64} {
  func.func @cosine_kernel(%arg0: i32, %arg1: memref<1x1x32xf32, #tpu.memory_space<vmem>>, %arg2: memref<1x8x32xf32, #tpu.memory_space<vmem>>, %arg3: memref<1x1x8xf32, #tpu.memory_space<vmem>>) attributes {dimension_semantics = [#tpu.dimension_semantics<parallel>], iteration_bounds = array<i64: 2>, scalar_prefetch = 0 : i64, scratch_operands = 0 : i64, tpu.core_type = #tpu.core_type<tc>, window_params = [{transform_indices = @transform_0, window_bounds = array<i64: 1, 1, 32>}, {transform_indices = @transform_1, window_bounds = array<i64: 1, 8, 32>}, {transform_indices = @transform_2, window_bounds = array<i64: 1, 1, 8>}]} {
    %c0 = arith.constant 0 : index
    %c0_0 = arith.constant 0 : index
    %c0_1 = arith.constant 0 : index
    %0 = vector.load %arg1[%c0, %c0_0, %c0_1] : memref<1x1x32xf32, #tpu.memory_space<vmem>>, vector<1x1x32xf32>
    %1 = vector.shape_cast %0 : vector<1x1x32xf32> to vector<1x32xf32>
    %c0_2 = arith.constant 0 : index
    %c0_3 = arith.constant 0 : index
    %c0_4 = arith.constant 0 : index
    %2 = vector.load %arg2[%c0_2, %c0_3, %c0_4] : memref<1x8x32xf32, #tpu.memory_space<vmem>>, vector<1x8x32xf32>
    %3 = vector.shape_cast %2 : vector<1x8x32xf32> to vector<8x32xf32>
    %4 = arith.mulf %1, %1 : vector<1x32xf32>
    %cst = arith.constant dense<0.000000e+00> : vector<1xf32>
    %5 = vector.multi_reduction <add>, %4, %cst [1] : vector<1x32xf32> to vector<1xf32>
    %6 = vector.shape_cast %5 : vector<1xf32> to vector<1x1xf32>
    %cst_5 = arith.constant 1.000000e-16 : f32
    %7 = vector.broadcast %cst_5 : f32 to vector<1x1xf32>
    %8 = arith.maximumf %6, %7 : vector<1x1xf32>
    %9 = math.rsqrt %8 : vector<1x1xf32>
    %10 = arith.mulf %3, %3 : vector<8x32xf32>
    %cst_6 = arith.constant dense<0.000000e+00> : vector<8xf32>
    %11 = vector.multi_reduction <add>, %10, %cst_6 [1] : vector<8x32xf32> to vector<8xf32>
    %12 = vector.shape_cast %11 : vector<8xf32> to vector<8x1xf32>
    %cst_7 = arith.constant 1.000000e-16 : f32
    %13 = vector.broadcast %cst_7 : f32 to vector<8x1xf32>
    %14 = arith.maximumf %12, %13 : vector<8x1xf32>
    %15 = math.rsqrt %14 : vector<8x1xf32>
    %16 = vector.broadcast %9 : vector<1x1xf32> to vector<1x32xf32>
    %17 = arith.mulf %1, %16 : vector<1x32xf32>
    %18 = vector.broadcast %15 : vector<8x1xf32> to vector<8x32xf32>
    %19 = arith.mulf %3, %18 : vector<8x32xf32>
    "tpu.trace_start"() <{level = 10 : i32, message = "qh,kh->qk"}> : () -> ()
    %cst_8 = arith.constant dense<0.000000e+00> : vector<1x8xf32>
    %20 = tpu.matmul %17, %19, %cst_8 {dimension_numbers = #tpu.dot_dimension_numbers<[1], [1], [0], [0], [0, 0, 1, 0], [], []>} : vector<1x32xf32>, vector<8x32xf32>, vector<1x8xf32> -> vector<1x8xf32>
    "tpu.trace_stop"() : () -> ()
    %c0_9 = arith.constant 0 : index
    %c0_10 = arith.constant 0 : index
    %c0_11 = arith.constant 0 : index
    %21 = vector.load %arg3[%c0_9, %c0_10, %c0_11] : memref<1x1x8xf32, #tpu.memory_space<vmem>>, vector<1x1x8xf32>
    %22 = vector.shape_cast %21 : vector<1x1x8xf32> to vector<1x8xf32>
    %23 = vector.shape_cast %20 : vector<1x8xf32> to vector<1x1x8xf32>
    tpu.vector_store %arg3[%c0_9, %c0_10, %c0_11], %23 {strides = array<i32>} : memref<1x1x8xf32, #tpu.memory_space<vmem>>, vector<1x1x8xf32>,
    return
  }
  func.func @transform_0(%arg0: i32) -> (i32, i32, i32) {
    %c0_i32 = arith.constant 0 : i32
    %c0_i32_0 = arith.constant 0 : i32
    %c0_i32_1 = arith.constant 0 : i32
    return %arg0, %c0_i32, %c0_i32_0 : i32, i32, i32
  }
  func.func @transform_1(%arg0: i32) -> (i32, i32, i32) {
    %c0_i32 = arith.constant 0 : i32
    %c0_i32_0 = arith.constant 0 : i32
    %c0_i32_1 = arith.constant 0 : i32
    return %arg0, %c0_i32, %c0_i32_0 : i32, i32, i32
  }
  func.func @transform_2(%arg0: i32) -> (i32, i32, i32) {
    %c0_i32 = arith.constant 0 : i32
    %c0_i32_0 = arith.constant 0 : i32
    %c0_i32_1 = arith.constant 0 : i32
    return %arg0, %c0_i32, %c0_i32_0 : i32, i32, i32
  }
}

</mosaic_0001>

<bundles_post_ra>
// kernel: forward.2
= control target key start
LH: loop header
LB: loop body
LE: loop exit
PB: predicated region body
PF: predicated region fallthrough
CT: control target
= control target key end

     0   :  { %s442_s12 = smov 0   ;;  %s514_s0 = inlined_call_operand.vmem [shape: f32[16,128], index: 0, kind: input, shape index: {}]   ;;  %s515_s1 = inlined_call_operand.vmem [shape: f32[128,128], index: 1, kind: input, shape index: {}]   ;;  %s516_s2 = inlined_call_operand.vmem [shape: f32[1,128], index: 2, kind: input, shape index: {}]   ;;  %s517_s3 = inlined_call_operand.vmem [shape: f32[16,128], index: 3, kind: output, shape index: {}]  }
   0x1 LB: > { %s314_s13 = sadd.s32 4294967295, %s417_s12   ;;  %p318_p0 = scmp.ge.s32.totalorder %s417_s12, 1  ;;  %s417_s12 = sphi %s442_s12, %s13_s12  }
   0x2   : > { %p136_p1 = scmp.lt.s32.totalorder %s417_s12, 3 }
   0x4   : > { %p137_p2 = pnand %p318_p0, %p136_p1 }
   0x5   : > { %v167_v0 = vld [vmem:[%s515_s1] sm:$0xff] (!%p137_p2)  ;;  %v168_v1 = vld [vmem:[%s515_s1 + $0x8] sm:$0xff] (!%p137_p2)  ;;  %v169_v2 = vld [vmem:[%s515_s1 + $0x10] sm:$0xff] (!%p137_p2)  ;;  %v419_v3 = vmov (!%p137_p2), 0.0|0.0   ;;  %vm420_vm0 = vmmov (!%p137_p2), 0   ;;  %v421_v6 = vmov (!%p137_p2), 0.0  }
   0x6   : > { %140 = sbr.rel (%p137_p2) target bundleno = 254 (0xfe), region = 32  ;;  %376 = vmatprep.subr.bf16.mxu0 (!%p137_p2), %v419_v3  ;;  %v377_v4 = vpack.c.bf16 (!%p137_p2), %v168_v1, %v167_v0  ;;  %v170_v5 = vld [vmem:[%s515_s1 + $0x18] sm:$0xff] (!%p137_p2)  ;;  %373 = vmatprep.mubr.msk.f32.mxu0 (!%p137_p2), %vm420_vm0, %v421_v6  ;;  %v171_v8 = vld [vmem:[%s515_s1 + $0x20] sm:$0xff] (!%p137_p2)  ;;  %v172_v9 = vld [vmem:[%s515_s1 + $0x28] sm:$0xff] (!%p137_p2)  ;;  %p158_p3 = scmp.lt.s32.totalorder (!%p137_p2), %s314_s13, 1 }
   0x7   : > { %v380_v7 = vpack.c.bf16 (!%p137_p2), %v170_v5, %v169_v2  ;;  %v383_v10 = vpack.c.bf16 (!%p137_p2), %v172_v9, %v171_v8  ;;  %v173_v11 = vld [vmem:[%s515_s1 + $0x30] sm:$0xff] (!%p137_p2)  ;;  %v174_v12 = vld [vmem:[%s515_s1 + $0x38] sm:$0xff] (!%p137_p2)  ;;  %v175_v14 = vld [vmem:[%s515_s1 + $0x40] sm:$0xff] (!%p137_p2) }
   0x8   : > { %378 = vmatpush3.bf16.msra.mxu0 (!%p137_p2), %v377_v4  ;;  %v386_v13 = vpack.c.bf16 (!%p137_p2), %v174_v12, %v173_v11  ;;  %v176_v15 = vld [vmem:[%s515_s1 + $0x48] sm:$0xff] (!%p137_p2)  ;;  %v177_v17 = vld [vmem:[%s515_s1 + $0x50] sm:$0xff] (!%p137_p2)  ;;  %v178_v18 = vld [vmem:[%s515_s1 + $0x58] sm:$0xff] (!%p137_p2) }
   0x9   : > { %379 = vmatprep.subr.bf16.mxu0 (!%p137_p2), %v419_v3  ;;  %v389_v16 = vpack.c.bf16 (!%p137_p2), %v176_v15, %v175_v14  ;;  %v392_v19 = vpack.c.bf16 (!%p137_p2), %v178_v18, %v177_v17  ;;  %v179_v20 = vld [vmem:[%s515_s1 + $0x60] sm:$0xff] (!%p137_p2)  ;;  %v180_v21 = vld [vmem:[%s515_s1 + $0x68] sm:$0xff] (!%p137_p2)  ;;  %v181_v23 = vld [vmem:[%s515_s1 + $0x70] sm:$0xff] (!%p137_p2) }
   0xa   : > { %v395_v22 = vpack.c.bf16 (!%p137_p2), %v180_v21, %v179_v20  ;;  %v182_v24 = vld [vmem:[%s515_s1 + $0x78] sm:$0xff] (!%p137_p2)  ;;  %v321_v27 = vld [vmem:[%s516_s2] ss:$0 sm:$0xff] (!%p137_p2) }
   0xb   : > { %v398_v25 = vpack.c.bf16 (!%p137_p2), %v182_v24, %v181_v23 }
   0xc   : > { %381 = vmatpush3.bf16.msra.mxu0 (!%p137_p2), %v380_v7 }
   0xd   : > { %382 = vmatprep.subr.bf16.mxu0 %v419_v3  ;;  %s519_s13 = smov (!%p158_p3, %s314_s13), 1 }
   0xe   : > { %s319_s21 = sshll.u32 %s519_s13, 3 }
   0xf   : > { %s161_s24 = scalar_lea.vmem %s514_s0, %s319_s21  ;;  %s165_s29 = scalar_lea.vmem %s517_s3, %s319_s21 }
  0x10   : > { %384 = vmatpush3.bf16.msra.mxu0 %v383_v10  ;;  %v166_v26 = vld [vmem:[%s161_s24] sm:$0xff] }
  0x11   : > { %385 = vmatprep.subr.bf16.mxu0 %v419_v3 }
  0x14   : > { %387 = vmatpush3.bf16.msra.mxu0 %v386_v13 }
  0x15   : > { %388 = vmatprep.subr.bf16.mxu0 %v419_v3 }
  0x18   : > { %390 = vmatpush3.bf16.msra.mxu0 %v389_v16 }
  0x19   : > { %391 = vmatprep.subr.bf16.mxu0 %v419_v3 }
  0x1c   : > { %393 = vmatpush3.bf16.msra.mxu0 %v392_v19 }
  0x1d   : > { %394 = vmatprep.subr.bf16.mxu0 %v419_v3 }
  0x20   : > { %396 = vmatpush3.bf16.msra.mxu0 %v395_v22 }
  0x21   : > { %397 = vmatprep.subr.bf16.mxu0 %v419_v3 }
  0x24   : > { %399 = vmatpush3.bf16.msra.mxu0 %v398_v25 }
  0x27   : > { %374 = vmatmul.mubr.f32.vlgmr.msra.gmra.mrb[0].mxu0 %v166_v26 }
  0xfa   : > { %v256_v28 = vpop.f32.mrb[0].mxu0 }
  0xfb   : > { %v257_v29 = vadd.f32 %v321_v27, %v256_v28  ;;  %v375_v30 = vpop.f32.mrb[1].mxu0 }
  0xfd   : > { %260 = vst [vmem:[%s165_s29] sm:$0xff] %v257_v29 }
  0xfe PF: > { %s13_s12 = sadd.s32 1, %s417_s12  }
  0xff   : > { %p10_p4 = scmp.ge.s32.totalorder %s13_s12, 4  }
 0x101   :  { %12 = sbr.rel (!%p10_p4) target bundleno = 1 (0x1), region = 62 }

// kernel: forward.3
= control target key start
LH: loop header
LB: loop body
LE: loop exit
PB: predicated region body
PF: predicated region fallthrough
CT: control target
= control target key end

     0   :  { %s359_s9 = smov 0   ;;  %s387_s0 = inlined_call_operand.vmem [shape: f32[2,1,32], index: 0, kind: input, shape index: {}]   ;;  %s388_s1 = inlined_call_operand.vmem [shape: f32[2,8,32], index: 1, kind: input, shape index: {}]   ;;  %s389_s2 = inlined_call_operand.vmem [shape: f32[2,1,8], index: 2, kind: output, shape index: {}]  }
   0x1 LB: > { %s303_s10 = sadd.s32 4294967295, %s340_s9   ;;  %p307_p0 = scmp.ge.s32.totalorder %s340_s9, 1  ;;  %s340_s9 = sphi %s359_s9, %s12_s9  }
   0x2   : > { %p119_p1 = scmp.lt.s32.totalorder %s340_s9, 3 }
   0x4   : > { %p120_p2 = pnand %p307_p0, %p119_p1 }
   0x5   : > { %p141_p3 = scmp.lt.s32.totalorder (!%p120_p2), %s303_s10, 1  ;;  %vm161_vm0 = vcmask (!%p120_p2), 261120   ;;  %vm154_vm1 = vcmask (!%p120_p2), 253952   ;;  %v342_v6 = vmov (!%p120_p2), 0.0   ;;  %vm343_vm2 = vmmov (!%p120_p2), 0  }
   0x6   : > { %123 = sbr.rel (%p120_p2) target bundleno = 394 (0x18a), region = 28  ;;  %315 = vmatprep.subr.mxu0 (!%p120_p2), %v342_v6  ;;  %317 = vmatprep.mubr.msk.f32.mxu0 (!%p120_p2), %vm343_vm2, %v342_v6  ;;  %vm245_vm3 = vcmask (!%p120_p2), 57344  }
   0xd   : > { %s391_s10 = smov (!%p141_p3, %s303_s10), 1 }
   0xe   : > { %s308_s11 = sshll.u32 %s391_s10, 3  ;;  %s143_s14 = scalar_lea.vmem %s387_s0, %s391_s10 }
   0xf   : > { %s147_s17 = scalar_lea.vmem %s388_s1, %s308_s11  ;;  %v151_v0 = vld [vmem:[%s143_s14] sm:$0x1]  ;;  %s150_s20 = scalar_lea.vmem %s389_s2, %s391_s10 }
  0x10   : > { %v152_v1 = vld [vmem:[%s147_s17] sm:$0xff]  ;;  %v153_v3 = vmul.f32 %v151_v0, %v151_v0 }
  0x11   : > { %v160_v2 = vmul.f32 %v152_v1, %v152_v1 }
  0x12   : > { %v155_v5 = vsel %vm154_vm1, %v153_v3, 0.0 }
  0x13   : > { %v162_v4 = vsel %vm161_vm0, %v160_v2, 0.0 }
  0x14   : > { %163 = vadd.xlane.f32.xlu0 %v162_v4 }
  0x18   : > { %156 = vadd.xlane.f32.xlu0 %v155_v5 }
  0xa1   : > { %v164_v7 = vpop.xlane.xlu0 %163 }
  0xa2   : > { %v165_v8 = vmax.f32 %v164_v7, 1e-16 }
  0xa4   : > { %330 = vrsqrt.f32 %v165_v8 }
  0xa5   : > { %v157_v9 = vpop.xlane.xlu0 %156 }
  0xa6   : > { %v158_v10 = vmax.f32 %v157_v9, 1e-16 }
  0xa8   : > { %332 = vrsqrt.f32 %v158_v10 }
  0xae   : > { %v331_v11 = vpop.eup %330 }
  0xaf   : > { %v168_v12 = vmul.f32 %v331_v11, %v152_v1 }
  0xb1   : > { %316 = vmatpush3.xpose.msk.msra.mxu0 %vm161_vm0, %v168_v12 }
  0xb2   : > { %v333_v13 = vpop.eup %332 }
  0xb3   : > { %v167_v14 = vmul.f32 %v333_v13, %v151_v0 }
  0xb5   : > { %318 = vmatmul.mubr.msk.f32.vlgmr.msra.gmra.mrb[0].mxu0 %vm161_vm0, %v167_v14 }
 0x188   : > { %v241_v15 = vpop.f32.mrb[0].mxu0 }
 0x189   : > { %246 = vst.msk [vmem:[%s150_s20] sm:$0x1] %vm245_vm3, %v241_v15  ;;  %v319_v16 = vpop.f32.mrb[1].mxu0 }
 0x18a PF: > { %s12_s9 = sadd.s32 1, %s340_s9  }
 0x18b   : > { %p9_p4 = scmp.ge.s32.totalorder %s12_s9, 4  }
 0x18d   :  { %11 = sbr.rel (!%p9_p4) target bundleno = 1 (0x1), region = 61 }

</bundles_post_ra>
